<compile_context>
chip_gen: v7x
topology: tpu7x:2x2x1
jax: 0.10.0
libtpu: 0.0.40
codegen_flags: <defaults>
</compile_context>

<pallas_src>
from functools import partial

import jax
import jax.numpy as jnp
from jax.experimental import pallas as pl
from jax.experimental.pallas import tpu as pltpu

# __init__ defaults of the PyTorch module (deterministic "parameters")
DIST_CE_WT = 5.0
HARD_CE_WT = 2.0
TEMP = 1.0

_LANE = 128
_NEG = -1e30  # acts as -inf for softmax padding but keeps all arithmetic finite


def _round_up(x, m):
    return ((x + m - 1) // m) * m


def _joint_distill_kernel(labels_ref, s_logits_ref, s_ams_ref, t_ams_ref,
                          out_ref, *, tile_n, n_true):
    i = pl.program_id(0)

    # Valid-row mask for the (possibly padded) tail tile.
    row = jax.lax.broadcasted_iota(jnp.int32, (tile_n, 1), 0)
    valid = ((i * tile_n + row) < n_true).astype(jnp.float32)         # (tile_n, 1)

    # ---- hard CE: per-row  logsumexp(z) - z[label]  (no (tile_n,C) logp temp) ----
    logits = s_logits_ref[...].astype(jnp.float32)                    # (tile_n, C)
    m = jnp.max(logits, axis=-1, keepdims=True)
    z = logits - m
    lse = jnp.log(jnp.sum(jnp.exp(z), axis=-1, keepdims=True))        # (tile_n, 1)
    labels = labels_ref[...]                                          # (tile_n, 1) i32
    col = jax.lax.broadcasted_iota(jnp.int32, z.shape, 1)
    z_lab = jnp.sum(jnp.where(col == labels, z, 0.0), axis=-1, keepdims=True)
    hard_rows = (lse - z_lab) * valid                                 # (tile_n, 1)
    # TODO(synk): no ignore_index handling (PyTorch F.cross_entropy default -100).

    # ---- soft-target CE over attention maps:  sum_k t * (lse2 - z2) ----
    sa = s_ams_ref[...].astype(jnp.float32)                           # (tile_n, K)
    ta = t_ams_ref[...].astype(jnp.float32)                           # (tile_n, K)
    m2 = jnp.max(sa, axis=-1, keepdims=True)
    z2 = sa - m2
    lse2 = jnp.log(jnp.sum(jnp.exp(z2), axis=-1, keepdims=True))      # (tile_n, 1)
    dist_rows = (lse2 * jnp.sum(ta, axis=-1, keepdims=True)
                 - jnp.sum(ta * z2, axis=-1, keepdims=True)) * valid  # (tile_n, 1)

    out_ref[0, 0] = jnp.sum(hard_rows)
    out_ref[0, 1] = jnp.sum(dist_rows)


def joint_distillation_loss(s_logits, s_ams, t_ams, true_labels, is_train=False,
                            dist_ce_wt=DIST_CE_WT, hard_ce_wt=HARD_CE_WT,
                            temp=TEMP):
    """Scalar joint distillation loss (float32); matches the PyTorch module."""
    n, c = s_logits.shape
    _, k = s_ams.shape
    tau = float(temp) if is_train else 1.0

    # Lane-dense padding of the class / attention-map axes (multiples of 128).
    c_pad = _round_up(c, _LANE)
    k_pad = _round_up(k, _LANE)
    if c_pad != c:
        s_logits = jnp.pad(s_logits, ((0, 0), (0, c_pad - c)),
                           constant_values=_NEG)
    if k_pad != k:
        s_ams = jnp.pad(s_ams, ((0, 0), (0, k_pad - k)), constant_values=_NEG)
        t_ams = jnp.pad(t_ams, ((0, 0), (0, k_pad - k)), constant_values=0)

    # Batch tile: multiple of 8 sublanes, one f32 block capped at ~2 MiB.
    widest = max(c_pad, k_pad)
    rows_budget = max(8, (2 * 1024 * 1024) // (widest * 4))
    tile_n = int(min(512, rows_budget, _round_up(n, 8)))
    tile_n = max(8, (tile_n // 8) * 8)
    n_pad = _round_up(n, tile_n)
    num_tiles = n_pad // tile_n

    labels2d = true_labels.astype(jnp.int32).reshape(-1, 1)           # (N, 1)
    if n_pad != n:
        pad_rows = ((0, n_pad - n), (0, 0))
        s_logits = jnp.pad(s_logits, pad_rows)
        s_ams = jnp.pad(s_ams, pad_rows)
        t_ams = jnp.pad(t_ams, pad_rows)
        labels2d = jnp.pad(labels2d, pad_rows)

    kernel = partial(_joint_distill_kernel, tile_n=tile_n, n_true=n)

    partials = pl.pallas_call(
        kernel,
        out_shape=jax.ShapeDtypeStruct((num_tiles, 2), jnp.float32),
        grid=(num_tiles,),
        in_specs=[
            pl.BlockSpec((tile_n, 1), lambda i: (i, 0)),              # labels
            pl.BlockSpec((tile_n, c_pad), lambda i: (i, 0)),          # s_logits
            pl.BlockSpec((tile_n, k_pad), lambda i: (i, 0)),          # s_ams
            pl.BlockSpec((tile_n, k_pad), lambda i: (i, 0)),          # t_ams
        ],
        out_specs=pl.BlockSpec((1, 2), lambda i: (i, 0),
                               memory_space=pltpu.SMEM),
        compiler_params=pltpu.CompilerParams(
            dimension_semantics=("parallel",),
            vmem_limit_bytes=32 * 1024 * 1024),
    )(labels2d, s_logits, s_ams, t_ams)

    hard_loss = jnp.sum(partials[:, 0]) / n
    dist_loss = jnp.sum(partials[:, 1]) / n
    # TODO(synk): vocab-scale C (single row-tile block too big for VMEM) would
    # need a second "arbitrary" grid axis over C with an online logsumexp.
    return (dist_ce_wt * dist_loss * (tau * tau)
            + hard_ce_wt * hard_loss).astype(jnp.float32)


def _reference_loss(s_logits, s_ams, t_ams, labels, is_train=False,
                    dist_ce_wt=DIST_CE_WT, hard_ce_wt=HARD_CE_WT, temp=TEMP):
    """Pure-JAX reference matching torch.nn.functional.cross_entropy semantics."""
    tau = float(temp) if is_train else 1.0
    logp = jax.nn.log_softmax(s_logits.astype(jnp.float32), axis=-1)
    hard = -jnp.mean(jnp.take_along_axis(logp, labels[:, None], axis=-1))
    logp2 = jax.nn.log_softmax(s_ams.astype(jnp.float32), axis=-1)
    dist = -jnp.mean(jnp.sum(t_ams.astype(jnp.float32) * logp2, axis=-1))
    return dist_ce_wt * dist * (tau ** 2) + hard_ce_wt * hard


if __name__ == "__main__":
    key = jax.random.PRNGKey(0)
    k1, k2, k3, k4 = jax.random.split(key, 4)

    N, C, K = 8, 16, 32          # batch, num classes, attention-map width
    s_logits = jax.random.normal(k1, (N, C), dtype=jnp.float32)
    s_ams = jax.random.normal(k2, (N, K), dtype=jnp.float32)
    # teacher attention maps as soft targets (probability distributions)
    t_ams = jax.nn.softmax(jax.random.normal(k3, (N, K), dtype=jnp.float32), axis=-1)
    true_labels = jax.random.randint(k4, (N,), 0, C, dtype=jnp.int32)

    # f32 path, exact check against the reference.
    loss = joint_distillation_loss(s_logits, s_ams, t_ams, true_labels, is_train=False)
    loss = jax.block_until_ready(loss)
    ref = _reference_loss(s_logits, s_ams, t_ams, true_labels, is_train=False)
    assert jnp.allclose(loss, ref, rtol=1e-5, atol=1e-5), (loss, ref)

    # bf16 inputs (half HBM traffic); compute stays f32 inside the kernel.
    sl_b, sa_b, ta_b = (x.astype(jnp.bfloat16) for x in (s_logits, s_ams, t_ams))
    loss_bf16 = joint_distillation_loss(sl_b, sa_b, ta_b, true_labels, is_train=True)
    loss_bf16 = jax.block_until_ready(loss_bf16)
    ref_bf16 = _reference_loss(sl_b, sa_b, ta_b, true_labels, is_train=True)
    assert jnp.allclose(loss_bf16, ref_bf16, rtol=5e-2, atol=5e-2), (loss_bf16, ref_bf16)

    print("KERNEL_OK")
</pallas_src>

<mosaic_0001>
module attributes {stable_mosaic.version = 11 : i64} {
  func.func @_joint_distill_kernel(%arg0: i32, %arg1: memref<8x1xi32, #tpu.memory_space<vmem>>, %arg2: memref<8x128xf32, #tpu.memory_space<vmem>>, %arg3: memref<8x128xf32, #tpu.memory_space<vmem>>, %arg4: memref<8x128xf32, #tpu.memory_space<vmem>>, %arg5: memref<1x2xf32, #tpu.memory_space<smem>>) attributes {dimension_semantics = [#tpu.dimension_semantics<parallel>], iteration_bounds = array<i64: 1>, scalar_prefetch = 0 : i64, scratch_operands = 0 : i64, tpu.core_type = #tpu.core_type<tc>, window_params = [{transform_indices = @transform_0, window_bounds = array<i64: 8, 1>}, {transform_indices = @transform_1, window_bounds = array<i64: 8, 128>}, {transform_indices = @transform_2, window_bounds = array<i64: 8, 128>}, {transform_indices = @transform_3, window_bounds = array<i64: 8, 128>}, {transform_indices = @transform_4, window_bounds = array<i64: 1, 2>}]} {
    %0 = tpu.iota {dimensions = array<i32: 0>} : vector<8x1xi32>
    %c8_i32 = arith.constant 8 : i32
    %1 = arith.muli %arg0, %c8_i32 : i32
    %2 = vector.broadcast %1 : i32 to vector<8x1xi32>
    %3 = arith.addi %2, %0 : vector<8x1xi32>
    %c8_i32_0 = arith.constant 8 : i32
    %4 = vector.broadcast %c8_i32_0 : i32 to vector<8x1xi32>
    %5 = arith.cmpi slt, %3, %4 : vector<8x1xi32>
    %6 = arith.extui %5 : vector<8x1xi1> to vector<8x1xi32>
    %7 = arith.sitofp %6 : vector<8x1xi32> to vector<8x1xf32>
    %c0 = arith.constant 0 : index
    %c0_1 = arith.constant 0 : index
    %8 = vector.load %arg2[%c0, %c0_1] : memref<8x128xf32, #tpu.memory_space<vmem>>, vector<8x128xf32>
    %cst = arith.constant dense<0xFF800000> : vector<8xf32>
    %9 = vector.multi_reduction <maximumf>, %8, %cst [1] : vector<8x128xf32> to vector<8xf32>
    %10 = vector.shape_cast %9 : vector<8xf32> to vector<8x1xf32>
    %11 = vector.broadcast %10 : vector<8x1xf32> to vector<8x128xf32>
    %12 = arith.subf %8, %11 : vector<8x128xf32>
    %13 = math.exp %12 : vector<8x128xf32>
    %cst_2 = arith.constant dense<0.000000e+00> : vector<8xf32>
    %14 = vector.multi_reduction <add>, %13, %cst_2 [1] : vector<8x128xf32> to vector<8xf32>
    %15 = vector.shape_cast %14 : vector<8xf32> to vector<8x1xf32>
    %16 = math.log %15 : vector<8x1xf32>
    %c0_3 = arith.constant 0 : index
    %c0_4 = arith.constant 0 : index
    %17 = vector.load %arg1[%c0_3, %c0_4] : memref<8x1xi32, #tpu.memory_space<vmem>>, vector<8x1xi32>
    %18 = tpu.iota {dimensions = array<i32: 1>} : vector<8x128xi32>
    %19 = vector.broadcast %17 : vector<8x1xi32> to vector<8x128xi32>
    %20 = arith.cmpi eq, %18, %19 : vector<8x128xi32>
    %cst_5 = arith.constant 0.000000e+00 : f32
    %21 = vector.broadcast %cst_5 : f32 to vector<8x128xf32>
    %22 = arith.select %20, %12, %21 : vector<8x128xi1>, vector<8x128xf32>
    %cst_6 = arith.constant dense<0.000000e+00> : vector<8xf32>
    %23 = vector.multi_reduction <add>, %22, %cst_6 [1] : vector<8x128xf32> to vector<8xf32>
    %24 = vector.shape_cast %23 : vector<8xf32> to vector<8x1xf32>
    %25 = arith.subf %16, %24 : vector<8x1xf32>
    %26 = arith.mulf %25, %7 : vector<8x1xf32>
    %c0_7 = arith.constant 0 : index
    %c0_8 = arith.constant 0 : index
    %27 = vector.load %arg3[%c0_7, %c0_8] : memref<8x128xf32, #tpu.memory_space<vmem>>, vector<8x128xf32>
    %c0_9 = arith.constant 0 : index
    %c0_10 = arith.constant 0 : index
    %28 = vector.load %arg4[%c0_9, %c0_10] : memref<8x128xf32, #tpu.memory_space<vmem>>, vector<8x128xf32>
    %cst_11 = arith.constant dense<0xFF800000> : vector<8xf32>
    %29 = vector.multi_reduction <maximumf>, %27, %cst_11 [1] : vector<8x128xf32> to vector<8xf32>
    %30 = vector.shape_cast %29 : vector<8xf32> to vector<8x1xf32>
    %31 = vector.broadcast %30 : vector<8x1xf32> to vector<8x128xf32>
    %32 = arith.subf %27, %31 : vector<8x128xf32>
    %33 = math.exp %32 : vector<8x128xf32>
    %cst_12 = arith.constant dense<0.000000e+00> : vector<8xf32>
    %34 = vector.multi_reduction <add>, %33, %cst_12 [1] : vector<8x128xf32> to vector<8xf32>
    %35 = vector.shape_cast %34 : vector<8xf32> to vector<8x1xf32>
    %36 = math.log %35 : vector<8x1xf32>
    %cst_13 = arith.constant dense<0.000000e+00> : vector<8xf32>
    %37 = vector.multi_reduction <add>, %28, %cst_13 [1] : vector<8x128xf32> to vector<8xf32>
    %38 = vector.shape_cast %37 : vector<8xf32> to vector<8x1xf32>
    %39 = arith.mulf %36, %38 : vector<8x1xf32>
    %40 = arith.mulf %28, %32 : vector<8x128xf32>
    %cst_14 = arith.constant dense<0.000000e+00> : vector<8xf32>
    %41 = vector.multi_reduction <add>, %40, %cst_14 [1] : vector<8x128xf32> to vector<8xf32>
    %42 = vector.shape_cast %41 : vector<8xf32> to vector<8x1xf32>
    %43 = arith.subf %39, %42 : vector<8x1xf32>
    %44 = arith.mulf %43, %7 : vector<8x1xf32>
    %45 = vector.shape_cast %26 : vector<8x1xf32> to vector<1x8x1xf32>
    %cst_15 = arith.constant dense<0.000000e+00> : vector<1xf32>
    %46 = vector.multi_reduction <add>, %45, %cst_15 [1, 2] : vector<1x8x1xf32> to vector<1xf32>
    %47 = vector.shape_cast %46 : vector<1xf32> to vector<1x1x1xf32>
    %48 = vector.extract %47[0, 0, 0] : f32 from vector<1x1x1xf32>
    %c0_16 = arith.constant 0 : index
    %c0_17 = arith.constant 0 : index
    %49 = memref.load %arg5[%c0_16, %c0_17] : memref<1x2xf32, #tpu.memory_space<smem>>
    memref.store %48, %arg5[%c0_16, %c0_17] : memref<1x2xf32, #tpu.memory_space<smem>>
    %50 = vector.shape_cast %44 : vector<8x1xf32> to vector<1x8x1xf32>
    %cst_18 = arith.constant dense<0.000000e+00> : vector<1xf32>
    %51 = vector.multi_reduction <add>, %50, %cst_18 [1, 2] : vector<1x8x1xf32> to vector<1xf32>
    %52 = vector.shape_cast %51 : vector<1xf32> to vector<1x1x1xf32>
    %53 = vector.extract %52[0, 0, 0] : f32 from vector<1x1x1xf32>
    %c0_19 = arith.constant 0 : index
    %c1 = arith.constant 1 : index
    %54 = memref.load %arg5[%c0_19, %c1] : memref<1x2xf32, #tpu.memory_space<smem>>
    memref.store %53, %arg5[%c0_19, %c1] : memref<1x2xf32, #tpu.memory_space<smem>>
    return
  }
  func.func @transform_0(%arg0: i32) -> (i32, i32) {
    %c0_i32 = arith.constant 0 : i32
    %c0_i32_0 = arith.constant 0 : i32
    return %arg0, %c0_i32 : i32, i32
  }
  func.func @transform_1(%arg0: i32) -> (i32, i32) {
    %c0_i32 = arith.constant 0 : i32
    %c0_i32_0 = arith.constant 0 : i32
    return %arg0, %c0_i32 : i32, i32
  }
  func.func @transform_2(%arg0: i32) -> (i32, i32) {
    %c0_i32 = arith.constant 0 : i32
    %c0_i32_0 = arith.constant 0 : i32
    return %arg0, %c0_i32 : i32, i32
  }
  func.func @transform_3(%arg0: i32) -> (i32, i32) {
    %c0_i32 = arith.constant 0 : i32
    %c0_i32_0 = arith.constant 0 : i32
    return %arg0, %c0_i32 : i32, i32
  }
  func.func @transform_4(%arg0: i32) -> (i32, i32) {
    %c0_i32 = arith.constant 0 : i32
    %c0_i32_0 = arith.constant 0 : i32
    return %arg0, %c0_i32 : i32, i32
  }
}

</mosaic_0001>

<bundles_post_ra>
// kernel: tpu_custom_call.1
= control target key start
LH: loop header
LB: loop body
LE: loop exit
PB: predicated region body
PF: predicated region fallthrough
CT: control target
= control target key end

     0   :  { %9 = vsyncpa [#allocation3], 0  ;;  %s232_s0 = inlined_call_operand.vmem [shape: s32[8,1], index: 0, kind: input, shape index: {}]   ;;  %s233_s1 = inlined_call_operand.vmem [shape: f32[8,128], index: 1, kind: input, shape index: {}]   ;;  %s234_s2 = inlined_call_operand.vmem [shape: f32[8,128], index: 2, kind: input, shape index: {}]   ;;  %s235_s3 = inlined_call_operand.hbm [shape: f32[8,128], index: 3, kind: input, shape index: {}]   ;;  %s236_s4 = inlined_call_operand.hbm [shape: f32[1,2], index: 4, kind: output, shape index: {}]  }
   0x1   :  { %10 = vsyncpa [#allocation4], 0  ;;  %s171_s15 = smov [#allocation2]   ;;  %s135_s19 = scalar_lea.hbm %s235_s3, 128 }
   0x2   :  { %s23_s16 = sshll.u32 %s171_s15, 4  ;;  %p136_p0 = scmp.ne.s32.totalorder %s235_s3, %s135_s19  ;;  %s24_s16 = int_to_ptr.vmem [resolvable:$true] %s23_s16 }
   0x3   :  { %p139_p1 = scmp.lt.u32.totalorder %s135_s19, %s235_s3 }
   0x5   :  { %p141_p2 = pnand %p139_p1, %p136_p0 }
   0x7   :  { %144 = shalt.err (!%p141_p2)
}
   0x8   :  { %s145_s24 = scalar_lea.vmem %s24_s16, 128  ;;  %p150_p4 = scmp.lt.s32.totalorder %s24_s16, %s24_s16 }
   0x9   :  { %p146_p3 = scmp.ne.s32.totalorder %s24_s16, %s145_s24  ;;  %p151_p5 = scmp.lt.s32.totalorder %s145_s24, %s145_s24 }
   0xb   :  { %p152_p6 = por %p151_p5, %p150_p4 }
   0xd   :  { %p153_p7 = pnand %p152_p6, %p146_p3 }
   0xf   :  { %156 = shalt.err (!%p153_p7)
}
  0x10   :  { %26 = dma.hbm_to_vmem [thread:$0]  %s235_s3, 128, %s24_s16, [#allocation3]  }
  0x11   :  { %167 = dma.done.wait [#allocation3], 128  }
  0x12   :  { %168 = vsyncadd [#allocation3], 4294967168  ;;  %v172_v0 = vmov 0   ;;  %v60_v1 = vld [vmem:[%s234_s2] sm:$0xff]  ;;  %v49_v11 = vlaneseq  ;;  %v61_v15 = vld [vmem:[#allocation2] sm:$0xff]  ;;  %vm79_vm1 = vcmask 7168  }
  0x13   :  { %125 = vset.pattern.permute.xlu1 %v172_v0  ;;  %126 = vset.pattern.permute.xlu0 %v172_v0  ;;  %v48_v2 = vld [vmem:[%s232_s0] sm:$0xff]  ;;  %s157_s7 = scalar_lea.hbm %s236_s4, 16 }
  0x14   :  { %62 = vmax.xlane.f32.xlu0 %v60_v1  ;;  %52 = vperm.xlu1 %125, %v48_v2   ;;  %v38_v3 = vld [vmem:[%s233_s1] sm:$0xff]  ;;  %v50_v13 = vand.u32 127, %v49_v11  ;;  %p158_p8 = scmp.ne.s32.totalorder %s236_s4, %s157_s7  ;;  %p161_p9 = scmp.lt.u32.totalorder %s157_s7, %s236_s4 }
  0x16   :  { %p163_p10 = pnand %p161_p9, %p158_p8 }
  0x18   :  { %39 = vmax.xlane.f32.xlu0 %v38_v3 }
  0x93   :  { %v53_v14 = vpop.permute.xlu1 %52 }
  0x94   :  { %vm54_vm0 = vcmp.eq.s32.totalorder %v50_v13, %v53_v14 }
  0xa1   :  { %v63_v4 = vpop.xlane.xlu0 %62 }
  0xa2   :  { %v64_v5 = vsub.f32 %v60_v1, %v63_v4 }
  0xa4   :  { %v65_v6 = vmul.f32 1.442695, %v64_v5  ;;  %v74_v17 = vmul.f32 %v64_v5, %v61_v15 }
  0xa5   :  { %v40_v7 = vpop.xlane.xlu0 %39 }
  0xa6   :  { %127 = vpow2.f32 %v65_v6  ;;  %v41_v8 = vsub.f32 %v38_v3, %v40_v7 }
  0xa8   :  { %v42_v9 = vmul.f32 1.442695, %v41_v8  ;;  %v55_v16 = vsel %vm54_vm0, %v41_v8, 0.0 }
  0xaa   :  { %129 = vpow2.f32 %v42_v9 }
  0xb0   :  { %v128_v10 = vpop.eup %127 }
  0xb1   :  { %67 = vadd.xlane.f32.xlu1 %v128_v10 }
  0xb4   :  { %v130_v12 = vpop.eup %129 }
  0xb5   :  { %44 = vadd.xlane.f32.xlu0 %v130_v12 }
  0xb9   :  { %71 = vadd.xlane.f32.xlu0 %v61_v15 }
  0xbd   :  { %56 = vadd.xlane.f32.xlu0 %v55_v16 }
  0xc1   :  { %75 = vadd.xlane.f32.xlu0 %v74_v17 }
 0x13e   :  { %v68_v18 = vpop.xlane.xlu1 %67 }
 0x13f   :  { %131 = vlog2.f32 %v68_v18 }
 0x142   :  { %v45_v19 = vpop.xlane.xlu0 %44 }
 0x143   :  { %133 = vlog2.f32 %v45_v19 }
 0x146   :  { %v72_v20 = vpop.xlane.xlu0 %71 }
 0x149   :  { %v132_v21 = vpop.eup %131 }
 0x14a   :  { %v70_v22 = vmul.f32 0.6931472, %v132_v21  ;;  %v57_v23 = vpop.xlane.xlu0 %56 }
 0x14c   :  { %v73_v25 = vmul.f32 %v72_v20, %v70_v22 }
 0x14d   :  { %v134_v24 = vpop.eup %133 }
 0x14e   :  { %v47_v26 = vmul.f32 0.6931472, %v134_v24  ;;  %v76_v27 = vpop.xlane.xlu0 %75 }
 0x14f   :  { %v77_v29 = vsub.f32 %v73_v25, %v76_v27 }
 0x150   :  { %v58_v28 = vsub.f32 %v47_v26, %v57_v23 }
 0x151   :  { %v92_v31 = vsel %vm79_vm1, %v77_v29, 0.0 }
 0x152   :  { %v80_v30 = vsel %vm79_vm1, %v58_v28, 0.0 }
 0x153   :  { %81 = vadd.xlane.f32.xlu0 %v80_v30 }
 0x157   :  { %93 = vadd.xlane.f32.xlu0 %v92_v31 }
 0x1e0   :  { %v82_v32 = vpop.xlane.xlu0 %81 }
 0x1e1   :  { %v83_v33 = vrot.slane %v82_v32, 4 }
 0x1e3   :  { %v84_v34 = vadd.f32 %v83_v33, %v82_v32 }
 0x1e4   :  { %v94_v35 = vpop.xlane.xlu0 %93 }
 0x1e5   :  { %v85_v36 = vrot.slane %v84_v34, 2  ;;  %v95_v37 = vrot.slane %v94_v35, 4 }
 0x1e7   :  { %v96_v38 = vadd.f32 %v95_v37, %v94_v35  ;;  %v86_v39 = vadd.f32 %v85_v36, %v84_v34 }
 0x1e9   :  { %v97_v40 = vrot.slane %v96_v38, 2  ;;  %v87_v41 = vrot.slane %v86_v39, 1 }
 0x1eb   :  { %v98_v42 = vadd.f32 %v97_v40, %v96_v38  ;;  %v88_v43 = vadd.f32 %v87_v41, %v86_v39 }
 0x1ed   :  { %118 = vpush %v88_v43  ;;  %v99_v44 = vrot.slane %v98_v42, 1 }
 0x1ef   :  { %v100_v45 = vadd.f32 %v99_v44, %v98_v42 }
 0x1f1   :  { %120 = vpush %v100_v45 }
 0x21e   :  { %s119_s0 = spop %118 }
 0x21f   :  { %91 = sst [smem:[#allocation5]] %s119_s0 }
 0x222   :  { %s121_s1 = spop %120 }
 0x223   :  { %103 = sst [smem:[#allocation5 + $0x1]] %s121_s1 }
 0x224   :  { %166 = shalt.err (!%p163_p10)
}
 0x225   :  { %s173_s12 = smov [#allocation5]  }
 0x226   :  { %111 = dma.smem_to_hbm %s173_s12, 16, %s236_s4, [#allocation4]  }
 0x227   :  { %169 = dma.done.wait [#allocation4], 16  }
 0x228   :  { %170 = vsyncadd [#allocation4], 4294967280 }
 0x229   :  { %115 = sfence }
 0x22a   :  { %116 = vsyncpa [#allocation3], 1 }
 0x22b   :  { %117 = vsyncpa [#allocation4], 1 }

</bundles_post_ra>
